<compile_context>
chip_gen: v5e
topology: v5e:2x2
jax: 0.10.0
libtpu: 0.0.40
codegen_flags: <defaults>
</compile_context>

<pallas_src>
import functools

import jax
import jax.numpy as jnp
from jax import lax
from jax.experimental import pallas as pl
from jax.experimental.pallas import tpu as pltpu

LANE = 128     # lane-dense padded class dimension
H3_PAD = 128   # lane-dense padded third hidden dimension


def mlp_softmax_kernel(x_ref, w1_ref, w2_ref, w3_ref, w4_ref, o_ref, *, d_out):
    # x arrives as bf16 from the wrapper; every matmul accumulates in f32.
    x = x_ref[...]

    h1 = jnp.maximum(
        jnp.dot(x, w1_ref[...], preferred_element_type=jnp.float32), 0.0)
    h2 = jnp.maximum(
        jnp.dot(h1.astype(jnp.bfloat16), w2_ref[...],
                preferred_element_type=jnp.float32), 0.0)
    h3 = jnp.maximum(
        jnp.dot(h2.astype(jnp.bfloat16), w3_ref[...],
                preferred_element_type=jnp.float32), 0.0)
    logits = jnp.dot(h3.astype(jnp.bfloat16), w4_ref[...],
                     preferred_element_type=jnp.float32)

    # w4 is zero-padded from d_out -> LANE output columns; mask the padded
    # classes to -inf so they contribute exactly 0 after the softmax.
    col = lax.broadcasted_iota(jnp.int32, logits.shape, dimension=1)
    logits = jnp.where(col < d_out, logits, -jnp.inf)

    # Numerically stable, *exact* softmax (no approx reciprocal).
    m = jnp.max(logits, axis=-1, keepdims=True)
    e = jnp.exp(logits - m)
    denom = jnp.sum(e, axis=-1, keepdims=True)
    o_ref[...] = (e / denom).astype(o_ref.dtype)


def _choose_batch_tile(B, block_b):
    """Batch tile: multiple of 8, and >=2 grid steps when B allows (v7x TCs)."""
    tb = min(block_b, B)
    if tb < B:
        tb = max(8, (tb // 8) * 8)
    # If the grid collapsed to a single step but B is big enough, split it so
    # v7x's second TensorCore gets work (harmless on v5e/v6e).
    if B >= 16 and pl.cdiv(B, tb) < 2:
        tb = max(8, ((pl.cdiv(B, 2) + 7) // 8) * 8)
    return tb


def net_forward(x_nchw, w1, w2, w3, w4_padded, *, d_out, block_b=512):
    """w1, w2: bf16 (in, out).  w3: bf16 (H2, H3_PAD) zero-padded cols.
    w4_padded: bf16 (H3_PAD, LANE), rows >= H3 and cols >= d_out are 0."""
    B = x_nchw.shape[0]
    # Same flattening as x.view(-1, 28*28); stream x in bf16 to halve x DMA.
    x = x_nchw.reshape(B, -1).astype(jnp.bfloat16)
    D_in = x.shape[1]

    TB = _choose_batch_tile(B, block_b)
    grid = (pl.cdiv(B, TB),)

    kernel = functools.partial(mlp_softmax_kernel, d_out=d_out)

    out_padded = pl.pallas_call(
        kernel,
        out_shape=jax.ShapeDtypeStruct((B, LANE), jnp.float32),
        grid=grid,
        in_specs=[
            # x tiles stream over the batch grid axis.
            pl.BlockSpec((TB, D_in), lambda i: (i, 0)),
            # Weights: constant index_map -> fetched once, VMEM-resident.
            pl.BlockSpec(w1.shape, lambda i: (0, 0)),
            pl.BlockSpec(w2.shape, lambda i: (0, 0)),
            pl.BlockSpec(w3.shape, lambda i: (0, 0)),
            pl.BlockSpec(w4_padded.shape, lambda i: (0, 0)),
        ],
        out_specs=pl.BlockSpec((TB, LANE), lambda i: (i, 0)),
        compiler_params=pltpu.CompilerParams(
            dimension_semantics=("parallel",)),
    )(x, w1, w2, w3, w4_padded)

    return out_padded[:, :d_out]


def init_params(key, D_in, H1, H2, H3, D_out):
    """Roughly nn.Linear's uniform(-1/sqrt(in), 1/sqrt(in)); stored (in, out)."""
    ks = jax.random.split(key, 4)

    def lin(k, fan_in, fan_out):
        bound = 1.0 / jnp.sqrt(fan_in)
        return jax.random.uniform(k, (fan_in, fan_out), jnp.float32,
                                  minval=-bound, maxval=bound)

    w1 = lin(ks[0], D_in, H1)
    w2 = lin(ks[1], H1, H2)
    w3 = lin(ks[2], H2, H3)
    w4 = lin(ks[3], H3, D_out)

    # bf16 weight storage.  Pad H3 -> H3_PAD (zero cols of w3, zero rows of
    # w4) and D_out -> LANE (zero cols of w4) so layers 3/4 and the output
    # store are lane-dense.  Exact: ReLU(0)=0 and zero w4 rows/cols add 0.
    w1b = w1.astype(jnp.bfloat16)
    w2b = w2.astype(jnp.bfloat16)
    w3b = jnp.zeros((H2, H3_PAD), jnp.bfloat16).at[:, :H3].set(
        w3.astype(jnp.bfloat16))
    w4b = jnp.zeros((H3_PAD, LANE), jnp.bfloat16).at[:H3, :D_out].set(
        w4.astype(jnp.bfloat16))
    return w1b, w2b, w3b, w4b


def reference_forward(x_nchw, w1, w2, w3, w4_padded, d_out):
    """Pure-JAX reference using the same bf16 weights / f32 accumulation."""
    B = x_nchw.shape[0]
    x = x_nchw.reshape(B, -1).astype(jnp.bfloat16)
    h1 = jnp.maximum(jnp.dot(x, w1, preferred_element_type=jnp.float32), 0.0)
    h2 = jnp.maximum(jnp.dot(h1.astype(jnp.bfloat16), w2,
                             preferred_element_type=jnp.float32), 0.0)
    h3 = jnp.maximum(jnp.dot(h2.astype(jnp.bfloat16), w3,
                             preferred_element_type=jnp.float32), 0.0)
    logits = jnp.dot(h3.astype(jnp.bfloat16), w4_padded[:, :d_out],
                     preferred_element_type=jnp.float32)
    return jax.nn.softmax(logits, axis=-1)


if __name__ == "__main__":
    # D_in is forced to 28*28 by the .view; keep the rest small.
    D_in, H1, H2, H3, D_out = 28 * 28, 256, 128, 64, 10
    B = 8

    key = jax.random.PRNGKey(0)
    kx, kp = jax.random.split(key)

    x = jax.random.normal(kx, (B, 1, 28, 28), jnp.float32)  # NCHW, like MNIST
    w1, w2, w3, w4p = init_params(kp, D_in, H1, H2, H3, D_out)

    y = net_forward(x, w1, w2, w3, w4p, d_out=D_out)
    y = jax.block_until_ready(y)

    assert y.shape == (B, D_out)
    # Exact softmax normalization now -> rows sum to 1 to f32 precision.
    assert bool(jnp.allclose(jnp.sum(y, axis=-1), 1.0, atol=1e-4))
    # Match the pure-JAX reference computed with the same bf16 weights.
    y_ref = reference_forward(x, w1, w2, w3, w4p, D_out)
    assert bool(jnp.allclose(y, y_ref, atol=2e-3))

    print("KERNEL_OK")
</pallas_src>

<mosaic_0001>
module attributes {stable_mosaic.version = 11 : i64} {
  func.func @mlp_softmax_kernel(%arg0: i32, %arg1: memref<8x784xbf16, #tpu.memory_space<vmem>>, %arg2: memref<784x256xbf16, #tpu.memory_space<vmem>>, %arg3: memref<256x128xbf16, #tpu.memory_space<vmem>>, %arg4: memref<128x128xbf16, #tpu.memory_space<vmem>>, %arg5: memref<128x128xbf16, #tpu.memory_space<vmem>>, %arg6: memref<8x128xf32, #tpu.memory_space<vmem>>) attributes {dimension_semantics = [#tpu.dimension_semantics<parallel>], iteration_bounds = array<i64: 1>, scalar_prefetch = 0 : i64, scratch_operands = 0 : i64, tpu.core_type = #tpu.core_type<tc>, window_params = [{transform_indices = @transform_0, window_bounds = array<i64: 8, 784>}, {pipeline_mode = #tpu.pipeline_mode<synchronous>, transform_indices = @transform_1, window_bounds = array<i64: 784, 256>}, {pipeline_mode = #tpu.pipeline_mode<synchronous>, transform_indices = @transform_2, window_bounds = array<i64: 256, 128>}, {pipeline_mode = #tpu.pipeline_mode<synchronous>, transform_indices = @transform_3, window_bounds = array<i64: 128, 128>}, {pipeline_mode = #tpu.pipeline_mode<synchronous>, transform_indices = @transform_4, window_bounds = array<i64: 128, 128>}, {transform_indices = @transform_5, window_bounds = array<i64: 8, 128>}]} {
    %c0 = arith.constant 0 : index
    %c0_0 = arith.constant 0 : index
    %0 = vector.load %arg1[%c0, %c0_0] : memref<8x784xbf16, #tpu.memory_space<vmem>>, vector<8x784xbf16>
    %c0_1 = arith.constant 0 : index
    %c0_2 = arith.constant 0 : index
    %1 = vector.load %arg2[%c0_1, %c0_2] : memref<784x256xbf16, #tpu.memory_space<vmem>>, vector<784x256xbf16>
    %cst = arith.constant dense<0.000000e+00> : vector<8x256xf32>
    %2 = tpu.matmul %0, %1, %cst {dimension_numbers = #tpu.dot_dimension_numbers<[1], [0], [0], [1], [0, 0, 1, 1], [], []>} : vector<8x784xbf16>, vector<784x256xbf16>, vector<8x256xf32> -> vector<8x256xf32>
    %cst_3 = arith.constant 0.000000e+00 : f32
    %3 = vector.broadcast %cst_3 : f32 to vector<8x256xf32>
    %4 = arith.maximumf %2, %3 : vector<8x256xf32>
    %5 = arith.truncf %4 : vector<8x256xf32> to vector<8x256xbf16>
    %c0_4 = arith.constant 0 : index
    %c0_5 = arith.constant 0 : index
    %6 = vector.load %arg3[%c0_4, %c0_5] : memref<256x128xbf16, #tpu.memory_space<vmem>>, vector<256x128xbf16>
    %cst_6 = arith.constant dense<0.000000e+00> : vector<8x128xf32>
    %7 = tpu.matmul %5, %6, %cst_6 {dimension_numbers = #tpu.dot_dimension_numbers<[1], [0], [0], [1], [0, 0, 1, 1], [], []>} : vector<8x256xbf16>, vector<256x128xbf16>, vector<8x128xf32> -> vector<8x128xf32>
    %cst_7 = arith.constant 0.000000e+00 : f32
    %8 = vector.broadcast %cst_7 : f32 to vector<8x128xf32>
    %9 = arith.maximumf %7, %8 : vector<8x128xf32>
    %10 = arith.truncf %9 : vector<8x128xf32> to vector<8x128xbf16>
    %c0_8 = arith.constant 0 : index
    %c0_9 = arith.constant 0 : index
    %11 = vector.load %arg4[%c0_8, %c0_9] : memref<128x128xbf16, #tpu.memory_space<vmem>>, vector<128x128xbf16>
    %cst_10 = arith.constant dense<0.000000e+00> : vector<8x128xf32>
    %12 = tpu.matmul %10, %11, %cst_10 {dimension_numbers = #tpu.dot_dimension_numbers<[1], [0], [0], [1], [0, 0, 1, 1], [], []>} : vector<8x128xbf16>, vector<128x128xbf16>, vector<8x128xf32> -> vector<8x128xf32>
    %cst_11 = arith.constant 0.000000e+00 : f32
    %13 = vector.broadcast %cst_11 : f32 to vector<8x128xf32>
    %14 = arith.maximumf %12, %13 : vector<8x128xf32>
    %15 = arith.truncf %14 : vector<8x128xf32> to vector<8x128xbf16>
    %c0_12 = arith.constant 0 : index
    %c0_13 = arith.constant 0 : index
    %16 = vector.load %arg5[%c0_12, %c0_13] : memref<128x128xbf16, #tpu.memory_space<vmem>>, vector<128x128xbf16>
    %cst_14 = arith.constant dense<0.000000e+00> : vector<8x128xf32>
    %17 = tpu.matmul %15, %16, %cst_14 {dimension_numbers = #tpu.dot_dimension_numbers<[1], [0], [0], [1], [0, 0, 1, 1], [], []>} : vector<8x128xbf16>, vector<128x128xbf16>, vector<8x128xf32> -> vector<8x128xf32>
    %18 = tpu.iota {dimensions = array<i32: 1>} : vector<8x128xi32>
    %c10_i32 = arith.constant 10 : i32
    %19 = vector.broadcast %c10_i32 : i32 to vector<8x128xi32>
    %20 = arith.cmpi slt, %18, %19 : vector<8x128xi32>
    %cst_15 = arith.constant 0xFF800000 : f32
    %21 = vector.broadcast %cst_15 : f32 to vector<8x128xf32>
    %22 = arith.select %20, %17, %21 : vector<8x128xi1>, vector<8x128xf32>
    %cst_16 = arith.constant dense<0xFF800000> : vector<8xf32>
    %23 = vector.multi_reduction <maximumf>, %22, %cst_16 [1] : vector<8x128xf32> to vector<8xf32>
    %24 = vector.shape_cast %23 : vector<8xf32> to vector<8x1xf32>
    %25 = vector.broadcast %24 : vector<8x1xf32> to vector<8x128xf32>
    %26 = arith.subf %22, %25 : vector<8x128xf32>
    %27 = math.exp %26 : vector<8x128xf32>
    %cst_17 = arith.constant dense<0.000000e+00> : vector<8xf32>
    %28 = vector.multi_reduction <add>, %27, %cst_17 [1] : vector<8x128xf32> to vector<8xf32>
    %29 = vector.shape_cast %28 : vector<8xf32> to vector<8x1xf32>
    %30 = vector.broadcast %29 : vector<8x1xf32> to vector<8x128xf32>
    %31 = arith.divf %27, %30 : vector<8x128xf32>
    %c0_18 = arith.constant 0 : index
    %c0_19 = arith.constant 0 : index
    %32 = vector.load %arg6[%c0_18, %c0_19] : memref<8x128xf32, #tpu.memory_space<vmem>>, vector<8x128xf32>
    tpu.vector_store %arg6[%c0_18, %c0_19], %31 {strides = array<i32>} : memref<8x128xf32, #tpu.memory_space<vmem>>, vector<8x128xf32>,
    return
  }
  func.func @transform_0(%arg0: i32) -> (i32, i32) {
    %c0_i32 = arith.constant 0 : i32
    %c0_i32_0 = arith.constant 0 : i32
    return %arg0, %c0_i32 : i32, i32
  }
  func.func @transform_1(%arg0: i32) -> (i32, i32) {
    %c0_i32 = arith.constant 0 : i32
    %c0_i32_0 = arith.constant 0 : i32
    %c0_i32_1 = arith.constant 0 : i32
    return %c0_i32, %c0_i32_0 : i32, i32
  }
  func.func @transform_2(%arg0: i32) -> (i32, i32) {
    %c0_i32 = arith.constant 0 : i32
    %c0_i32_0 = arith.constant 0 : i32
    %c0_i32_1 = arith.constant 0 : i32
    return %c0_i32, %c0_i32_0 : i32, i32
  }
  func.func @transform_3(%arg0: i32) -> (i32, i32) {
    %c0_i32 = arith.constant 0 : i32
    %c0_i32_0 = arith.constant 0 : i32
    %c0_i32_1 = arith.constant 0 : i32
    return %c0_i32, %c0_i32_0 : i32, i32
  }
  func.func @transform_4(%arg0: i32) -> (i32, i32) {
    %c0_i32 = arith.constant 0 : i32
    %c0_i32_0 = arith.constant 0 : i32
    %c0_i32_1 = arith.constant 0 : i32
    return %c0_i32, %c0_i32_0 : i32, i32
  }
  func.func @transform_5(%arg0: i32) -> (i32, i32) {
    %c0_i32 = arith.constant 0 : i32
    %c0_i32_0 = arith.constant 0 : i32
    return %arg0, %c0_i32 : i32, i32
  }
}

</mosaic_0001>

<bundles_post_ra>
// kernel: tpu_custom_call.1
= control target key start
LH: loop header
LB: loop body
LE: loop exit
PB: predicated region body
PF: predicated region fallthrough
CT: control target
= control target key end

     0   :  { %10 = vsyncpa [#allocation3], 0  ;;  %s2168_s0 = inlined_call_operand.hbm [shape: bf16[8,784], index: 0, kind: input, shape index: {}]   ;;  %s2169_s1 = inlined_call_operand.hbm [shape: bf16[784,256], index: 1, kind: input, shape index: {}]   ;;  %s2170_s2 = inlined_call_operand.hbm [shape: bf16[256,128], index: 2, kind: input, shape index: {}]   ;;  %s2171_s3 = inlined_call_operand.hbm [shape: bf16[128,128], index: 3, kind: input, shape index: {}]   ;;  %s2172_s4 = inlined_call_operand.hbm [shape: bf16[128,128], index: 4, kind: input, shape index: {}]   ;;  %s2173_s5 = inlined_call_operand.hbm [shape: f32[8,128], index: 5, kind: output, shape index: {}]  }
   0x1   :  { %11 = vsyncpa [#allocation6], 0 }
   0x2   :  { %12 = vsyncpa [#allocation9], 0  ;;  %s29_s20 = sshll.u32 %s2169_s1, 4  ;;  %s30_s20 = int_to_ptr.hbm [resolvable:$true] %s29_s20 }
   0x3   :  { %13 = vsyncpa [#allocation4], 0  ;;  %s2080_s21 = smov [#allocation5]   ;;  %s2081_s23 = smov 128  }
   0x4   :  { %s31_s22 = sshll.u32 %s2080_s21, 4  ;;  %s2082_s24 = smov 8   ;;  %s32_s22 = int_to_ptr.vmem [resolvable:$true] %s31_s22 }
   0x5   :  { %37 = dma.hbm_to_vmem [thread:$0]  %s30_s20, 12544, %s32_s22, [#allocation6], %s2081_s23, %s2081_s23, %s2082_s24  }
   0x6   :  { %s55_s27 = sshll.u32 %s2171_s3, 4  ;;  %s2083_s28 = smov [#allocation8]   ;;  %s56_s27 = int_to_ptr.hbm [resolvable:$true] %s55_s27 }
   0x7   :  { %s57_s29 = sshll.u32 %s2083_s28, 4  ;;  %s19_s7 = sshll.u32 %s2168_s0, 4  ;;  %s58_s29 = int_to_ptr.vmem [resolvable:$true] %s57_s29  ;;  %s20_s7 = int_to_ptr.hbm [resolvable:$true] %s19_s7 }
   0x8   :  { %s2084_s1 = smov 64   ;;  %s2085_s8 = smov 4  }
   0x9   :  { %63 = dma.hbm_to_vmem [thread:$0]  %s56_s27, 1024, %s58_s29, [#allocation9], %s2084_s1, %s2084_s1, %s2085_s8  }
   0xa   :  { %s42_s11 = sshll.u32 %s2170_s2, 4  ;;  %s2086_s12 = smov [#allocation2]   ;;  %s43_s11 = int_to_ptr.hbm [resolvable:$true] %s42_s11 }
   0xb   :  { %s21_s13 = sshll.u32 %s2086_s12, 4  ;;  %s2087_s3 = smov [#allocation7]   ;;  %s22_s13 = int_to_ptr.vmem [resolvable:$true] %s21_s13 }
   0xc   :  { %24 = dma.hbm_to_vmem [thread:$0]  %s20_s7, 448, %s22_s13, [#allocation3]  }
   0xd   :  { %s44_s14 = sshll.u32 %s2087_s3, 4  ;;  %s68_s0 = sshll.u32 %s2172_s4, 4  ;;  %s45_s14 = int_to_ptr.vmem [resolvable:$true] %s44_s14  ;;  %s69_s0 = int_to_ptr.hbm [resolvable:$true] %s68_s0 }
   0xe   :  { %50 = dma.hbm_to_vmem [thread:$0]  %s43_s11, 2048, %s45_s14, [#allocation6], %s2084_s1, %s2084_s1, %s2085_s8  }
   0xf   :  { %s2088_s17 = smov [#allocation10]  }
  0x10   :  { %s70_s18 = sshll.u32 %s2088_s17, 4  ;;  %s71_s18 = int_to_ptr.vmem [resolvable:$true] %s70_s18 }
  0x11   :  { %76 = dma.hbm_to_vmem [thread:$0]  %s69_s0, 1024, %s71_s18, [#allocation9], %s2084_s1, %s2084_s1, %s2085_s8  }
  0x12   :  { %2072 = dma.done.wait [#allocation3], 448  }
  0x13   :  { %2073 = vsyncadd [#allocation3], 4294966848 }
  0x14   :  { %2074 = dma.done.wait [#allocation6], 14592  }
  0x15   :  { %2075 = vsyncadd [#allocation6], 4294952704 }
  0x16   :  { %2076 = dma.done.wait [#allocation9], 2048  }
  0x17   :  { %2077 = vsyncadd [#allocation9], 4294965248  ;;  %v1320_v0 = vld [vmem:[#allocation5 + $0x70] sm:$0xf]  ;;  %v1799_v1 = vld [vmem:[#allocation5 + $0x74] sm:$0xf0] }
  0x18   :  { %v1448_v2 = vld [vmem:[#allocation5 + $0x170] sm:$0xf]  ;;  %v1321_v3 = vor.u32 %v1799_v1, %v1320_v0  ;;  %v1831_v4 = vld [vmem:[#allocation5 + $0x174] sm:$0xf0]  ;;  %v1312_v11 = vld [vmem:[#allocation5 + $0x60] sm:$0xf] }
  0x19   :  { %v1512_v5 = vld [vmem:[#allocation5 + $0x1f0] sm:$0xf]  ;;  %v1847_v6 = vld [vmem:[#allocation5 + $0x1f4] sm:$0xf0]  ;;  %v1449_v7 = vor.u32 %v1831_v4, %v1448_v2  ;;  %v1797_v13 = vld [vmem:[#allocation5 + $0x64] sm:$0xf0] }
  0x1a   :  { %v1513_v8 = vor.u32 %v1847_v6, %v1512_v5  ;;  %v1384_v9 = vld [vmem:[#allocation5 + $0xf0] sm:$0xf]  ;;  %v1815_v10 = vld [vmem:[#allocation5 + $0xf4] sm:$0xf0]  ;;  %718 = vmatpush.bf16.msra.mxu0 %v1321_v3  ;;  %v1440_v14 = vld [vmem:[#allocation5 + $0x160] sm:$0xf]  ;;  %v1313_v16 = vor.u32 %v1797_v13, %v1312_v11 }
  0x1b   :  { %v1385_v12 = vor.u32 %v1815_v10, %v1384_v9  ;;  %v1829_v15 = vld [vmem:[#allocation5 + $0x164] sm:$0xf0]  ;;  %744 = vmatpush.bf16.msra.mxu2 %v1449_v7  ;;  %v1504_v18 = vld [vmem:[#allocation5 + $0x1e0] sm:$0xf]  ;;  %v1304_v23 = vld [vmem:[#allocation5 + $0x50] sm:$0xf] }
  0x1c   :  { %757 = vmatpush.bf16.msra.mxu3 %v1513_v8  ;;  %v1441_v17 = vor.u32 %v1829_v15, %v1440_v14  ;;  %v1845_v19 = vld [vmem:[#allocation5 + $0x1e4] sm:$0xf0]  ;;  %v1376_v20 = vld [vmem:[#allocation5 + $0xe0] sm:$0xf]  ;;  %v1795_v24 = vld [vmem:[#allocation5 + $0x54] sm:$0xf0] }
  0x1d   :  { %731 = vmatpush.bf16.msra.mxu1 %v1385_v12  ;;  %v1505_v21 = vor.u32 %v1845_v19, %v1504_v18  ;;  %v1813_v22 = vld [vmem:[#allocation5 + $0xe4] sm:$0xf0]  ;;  %v1432_v26 = vld [vmem:[#allocation5 + $0x150] sm:$0xf]  ;;  %v1827_v27 = vld [vmem:[#allocation5 + $0x154] sm:$0xf0]  ;;  %v1305_v29 = vor.u32 %v1795_v24, %v1304_v23 }
  0x1e   :  { %v1377_v25 = vor.u32 %v1813_v22, %v1376_v20  ;;  %v1496_v28 = vld [vmem:[#allocation5 + $0x1d0] sm:$0xf]  ;;  %719 = vmatpush.bf16.msra.mxu0 %v1313_v16  ;;  %v1843_v30 = vld [vmem:[#allocation5 + $0x1d4] sm:$0xf0]  ;;  %v1433_v33 = vor.u32 %v1827_v27, %v1432_v26  ;;  %v1296_v35 = vld [vmem:[#allocation5 + $0x40] sm:$0xf] }
  0x1f   :  { %v1368_v31 = vld [vmem:[#allocation5 + $0xd0] sm:$0xf]  ;;  %v1811_v32 = vld [vmem:[#allocation5 + $0xd4] sm:$0xf0]  ;;  %745 = vmatpush.bf16.msra.mxu2 %v1441_v17  ;;  %v1497_v34 = vor.u32 %v1843_v30, %v1496_v28  ;;  %v1793_v36 = vld [vmem:[#allocation5 + $0x44] sm:$0xf0] }
  0x20   :  { %758 = vmatpush.bf16.msra.mxu3 %v1505_v21  ;;  %v1424_v37 = vld [vmem:[#allocation5 + $0x140] sm:$0xf]  ;;  %v1369_v38 = vor.u32 %v1811_v32, %v1368_v31  ;;  %v1825_v39 = vld [vmem:[#allocation5 + $0x144] sm:$0xf0]  ;;  %v1297_v44 = vor.u32 %v1793_v36, %v1296_v35  ;;  %v1288_v47 = vld [vmem:[#allocation5 + $0x30] sm:$0xf] }
  0x21   :  { %732 = vmatpush.bf16.msra.mxu1 %v1377_v25  ;;  %v1488_v40 = vld [vmem:[#allocation5 + $0x1c0] sm:$0xf]  ;;  %v1841_v41 = vld [vmem:[#allocation5 + $0x1c4] sm:$0xf0]  ;;  %v1425_v45 = vor.u32 %v1825_v39, %v1424_v37  ;;  %v1791_v48 = vld [vmem:[#allocation5 + $0x34] sm:$0xf0] }
  0x22   :  { %v1360_v42 = vld [vmem:[#allocation5 + $0xc0] sm:$0xf]  ;;  %v1809_v43 = vld [vmem:[#allocation5 + $0xc4] sm:$0xf0]  ;;  %720 = vmatpush.bf16.msra.mxu0 %v1305_v29  ;;  %v1489_v46 = vor.u32 %v1841_v41, %v1488_v40  ;;  %v1416_v49 = vld [vmem:[#allocation5 + $0x130] sm:$0xf]  ;;  %v1289_v56 = vor.u32 %v1791_v48, %v1288_v47 }
  0x23   :  { %746 = vmatpush.bf16.msra.mxu2 %v1433_v33  ;;  %v1361_v50 = vor.u32 %v1809_v43, %v1360_v42  ;;  %v1823_v51 = vld [vmem:[#allocation5 + $0x134] sm:$0xf0]  ;;  %v1480_v52 = vld [vmem:[#allocation5 + $0x1b0] sm:$0xf]  ;;  %v1280_v59 = vld [vmem:[#allocation5 + $0x20] sm:$0xf] }
  0x24   :  { %759 = vmatpush.bf16.msra.mxu3 %v1497_v34  ;;  %v1839_v53 = vld [vmem:[#allocation5 + $0x1b4] sm:$0xf0]  ;;  %v1352_v54 = vld [vmem:[#allocation5 + $0xb0] sm:$0xf]  ;;  %v1417_v57 = vor.u32 %v1823_v51, %v1416_v49  ;;  %v1789_v60 = vld [vmem:[#allocation5 + $0x24] sm:$0xf0] }
  0x25   :  { %733 = vmatpush.bf16.msra.mxu1 %v1369_v38  ;;  %v1807_v55 = vld [vmem:[#allocation5 + $0xb4] sm:$0xf0]  ;;  %v1481_v58 = vor.u32 %v1839_v53, %v1480_v52  ;;  %v1408_v61 = vld [vmem:[#allocation5 + $0x120] sm:$0xf]  ;;  %v1821_v63 = vld [vmem:[#allocation5 + $0x124] sm:$0xf0]  ;;  %v1281_v4 = vor.u32 %v1789_v60, %v1280_v59 }
  0x26   :  { %721 = vmatpush.bf16.msra.mxu0 %v1297_v44  ;;  %v1353_v62 = vor.u32 %v1807_v55, %v1352_v54  ;;  %v1472_v0 = vld [vmem:[#allocation5 + $0x1a0] sm:$0xf]  ;;  %v1837_v1 = vld [vmem:[#allocation5 + $0x1a4] sm:$0xf0]  ;;  %v1409_v5 = vor.u32 %v1821_v63, %v1408_v61  ;;  %v1272_v7 = vld [vmem:[#allocation5 + $0x10] sm:$0xf] }
  0x27   :  { %747 = vmatpush.bf16.msra.mxu2 %v1425_v45  ;;  %v1344_v2 = vld [vmem:[#allocation5 + $0xa0] sm:$0xf]  ;;  %v1805_v3 = vld [vmem:[#allocation5 + $0xa4] sm:$0xf0]  ;;  %v1473_v6 = vor.u32 %v1837_v1, %v1472_v0  ;;  %v1787_v8 = vld [vmem:[#allocation5 + $0x14] sm:$0xf0] }
  0x28   :  { %760 = vmatpush.bf16.msra.mxu3 %v1489_v46  ;;  %v1400_v9 = vld [vmem:[#allocation5 + $0x110] sm:$0xf]  ;;  %v1345_v10 = vor.u32 %v1805_v3, %v1344_v2  ;;  %v1819_v11 = vld [vmem:[#allocation5 + $0x114] sm:$0xf0]  ;;  %v1273_v16 = vor.u32 %v1787_v8, %v1272_v7  ;;  %v1264_v17 = vld [vmem:[#allocation5] sm:$0xf] }
  0x29   :  { %734 = vmatpush.bf16.msra.mxu1 %v1361_v50  ;;  %v1464_v12 = vld [vmem:[#allocation5 + $0x190] sm:$0xf]  ;;  %v1835_v13 = vld [vmem:[#allocation5 + $0x194] sm:$0xf0]  ;;  %v1785_v18 = vld [vmem:[#allocation5 + $0x4] sm:$0xf0]  ;;  %v1401_v20 = vor.u32 %v1819_v11, %v1400_v9 }
  0x2a   :  { %722 = vmatpush.bf16.msra.mxu0 %v1289_v56  ;;  %v1336_v14 = vld [vmem:[#allocation5 + $0x90] sm:$0xf]  ;;  %v1803_v15 = vld [vmem:[#allocation5 + $0x94] sm:$0xf0]  ;;  %v1392_v19 = vld [vmem:[#allocation5 + $0x100] sm:$0xf]  ;;  %v1465_v21 = vor.u32 %v1835_v13, %v1464_v12  ;;  %v1265_v32 = vor.u32 %v1785_v18, %v1264_v17 }
  0x2b   :  { %748 = vmatpush.bf16.msra.mxu2 %v1417_v57  ;;  %v1817_v22 = vld [vmem:[#allocation5 + $0x104] sm:$0xf0]  ;;  %v1456_v23 = vld [vmem:[#allocation5 + $0x180] sm:$0xf]  ;;  %v99_v24 = vld [vmem:[#allocation2 + $0x8] sm:$0xff]  ;;  %v1337_v25 = vor.u32 %v1803_v15, %v1336_v14  ;;  %vm714_vm0 = vcmask 130048  }
  0x2c   :  { %761 = vmatpush.bf16.msra.mxu3 %v1481_v58  ;;  %v1833_v26 = vld [vmem:[#allocation5 + $0x184] sm:$0xf0]  ;;  %v1576_v27 = vld [vmem:[#allocation5 + $0x270] sm:$0xf]  ;;  %v1863_v28 = vld [vmem:[#allocation5 + $0x274] sm:$0xf0]  ;;  %v206_v34 = vunpack.c.l.b16 %v99_v24  ;;  %v1393_v37 = vor.u32 %v1817_v22, %v1392_v19  ;;  %v207_v42 = vunpack.c.h.b16 %v99_v24 }
  0x2d   :  { %735 = vmatpush.bf16.msra.mxu1 %v1353_v62  ;;  %v1798_v29 = vld [vmem:[#allocation5 + $0x74] sm:$0xf]  ;;  %v1322_v30 = vld [vmem:[#allocation5 + $0x78] sm:$0xf0]  ;;  %v1328_v31 = vld [vmem:[#allocation5 + $0x80] sm:$0xf]  ;;  %v1457_v38 = vor.u32 %v1833_v26, %v1456_v23  ;;  %v1577_v43 = vor.u32 %v1863_v28, %v1576_v27 }
  0x2e   :  { %723 = vmatpush.bf16.msra.mxu0 %v1281_v4  ;;  %v1801_v33 = vld [vmem:[#allocation5 + $0x84] sm:$0xf0]  ;;  %v1648_v35 = vld [vmem:[#allocation5 + $0x300] sm:$0xf]  ;;  %v1640_v39 = vld [vmem:[#allocation5 + $0x2f0] sm:$0xf]  ;;  %v1325_v44 = vor.u32 %v1798_v29, %v1322_v30  ;;  %v2135_v53 = vpack.c.b16 %v206_v34, %v206_v34  ;;  %v2137_v60 = vpack.c.b16 %v207_v42, %v207_v42 }
  0x2f   :  { %749 = vmatpush.bf16.msra.mxu2 %v1409_v5  ;;  %v1881_v36 = vld [vmem:[#allocation5 + $0x304] sm:$0xf0]  ;;  %v1879_v40 = vld [vmem:[#allocation5 + $0x2f4] sm:$0xf0]  ;;  %v1814_v41 = vld [vmem:[#allocation5 + $0xf4] sm:$0xf]  ;;  %v1329_v48 = vor.u32 %v1801_v33, %v1328_v31 }
  0x30   :  { %762 = vmatpush.bf16.msra.mxu3 %v1473_v6  ;;  %v1386_v45 = vld [vmem:[#allocation5 + $0xf8] sm:$0xf0]  ;;  %v1568_v46 = vld [vmem:[#allocation5 + $0x260] sm:$0xf]  ;;  %v1861_v47 = vld [vmem:[#allocation5 + $0x264] sm:$0xf0]  ;;  %v1649_v49 = vor.u32 %v1881_v36, %v1648_v35  ;;  %v1641_v54 = vor.u32 %v1879_v40, %v1640_v39 }
  0x31   :  { %736 = vmatpush.bf16.msra.mxu1 %v1345_v10  ;;  %v1796_v50 = vld [vmem:[#allocation5 + $0x64] sm:$0xf]  ;;  %v1314_v51 = vld [vmem:[#allocation5 + $0x68] sm:$0xf0]  ;;  %v1389_v57 = vor.u32 %v1814_v41, %v1386_v45  ;;  %v1632_v58 = vld [vmem:[#allocation5 + $0x2e0] sm:$0xf]  ;;  %v1569_v61 = vor.u32 %v1861_v47, %v1568_v46 }
  0x32   :  { %724 = vmatpush.bf16.msra.mxu0 %v1273_v16  ;;  %v98_v52 = vld [vmem:[#allocation2] sm:$0xff]  ;;  %v1317_v62 = vor.u32 %v1796_v50, %v1314_v51  ;;  %v1378_v0 = vld [vmem:[#allocation5 + $0xe8] sm:$0xf0]  ;;  %v1560_v1 = vld [vmem:[#allocation5 + $0x250] sm:$0xf]  ;;  %s2089_s2 = smov [#allocation11]  }
  0x33   :  { %750 = vmatpush.bf16.msra.mxu2 %v1401_v20  ;;  %v204_v55 = vunpack.c.l.b16 %v98_v52  ;;  %v205_v56 = vunpack.c.h.b16 %v98_v52  ;;  %v1877_v59 = vld [vmem:[#allocation5 + $0x2e4] sm:$0xf0]  ;;  %v1812_v63 = vld [vmem:[#allocation5 + $0xe4] sm:$0xf]  ;;  %v1859_v2 = vld [vmem:[#allocation5 + $0x254] sm:$0xf0] }
  0x34   :  { %763 = vmatpush.bf16.msra.mxu3 %v1465_v21  ;;  %v1794_v3 = vld [vmem:[#allocation5 + $0x54] sm:$0xf]  ;;  %v1306_v4 = vld [vmem:[#allocation5 + $0x58] sm:$0xf0]  ;;  %v1633_v7 = vor.u32 %v1877_v59, %v1632_v58  ;;  %v1381_v8 = vor.u32 %v1812_v63, %v1378_v0  ;;  %v1624_v9 = vld [vmem:[#allocation5 + $0x2d0] sm:$0xf]  ;;  %v1561_v11 = vor.u32 %v1859_v2, %v1560_v1 }
  0x35   :  { %737 = vmatpush.bf16.msra.mxu1 %v1337_v25  ;;  %v2139_v5 = vpack.c.b16 %v204_v55, %v204_v55  ;;  %v2141_v6 = vpack.c.b16 %v205_v56, %v205_v56  ;;  %v1875_v10 = vld [vmem:[#allocation5 + $0x2d4] sm:$0xf0]  ;;  %v1309_v12 = vor.u32 %v1794_v3, %v1306_v4  ;;  %v1810_v13 = vld [vmem:[#allocation5 + $0xd4] sm:$0xf]  ;;  %v1370_v14 = vld [vmem:[#allocation5 + $0xd8] sm:$0xf0] }
  0x36   :  { %725 = vmatpush.bf16.msra.mxu0 %v1265_v32  ;;  %v1552_v15 = vld [vmem:[#allocation5 + $0x240] sm:$0xf]  ;;  %v1857_v16 = vld [vmem:[#allocation5 + $0x244] sm:$0xf0]  ;;  %v1792_v17 = vld [vmem:[#allocation5 + $0x44] sm:$0xf]  ;;  %v1625_v19 = vor.u32 %v1875_v10, %v1624_v9  ;;  %v1373_v20 = vor.u32 %v1810_v13, %v1370_v14 }
  0x37   :  { %751 = vmatpush.bf16.msra.mxu2 %v1393_v37  ;;  %v1298_v18 = vld [vmem:[#allocation5 + $0x48] sm:$0xf0]  ;;  %v1616_v21 = vld [vmem:[#allocation5 + $0x2c0] sm:$0xf]  ;;  %v1873_v22 = vld [vmem:[#allocation5 + $0x2c4] sm:$0xf0]  ;;  %v1553_v24 = vor.u32 %v1857_v16, %v1552_v15 }
  0x38   :  { %764 = vmatpush.bf16.msra.mxu3 %v1457_v38  ;;  %v1808_v23 = vld [vmem:[#allocation5 + $0xc4] sm:$0xf]  ;;  %v1301_v25 = vor.u32 %v1792_v17, %v1298_v18  ;;  %v1362_v26 = vld [vmem:[#allocation5 + $0xc8] sm:$0xf0]  ;;  %v1544_v27 = vld [vmem:[#allocation5 + $0x230] sm:$0xf]  ;;  %v1617_v32 = vor.u32 %v1873_v22, %v1616_v21 }
  0x39   :  { %738 = vmatpush.bf16.msra.mxu1 %v1329_v48  ;;  %726 = vmatmul.bf16.vlgmr.msra.gmra.mxu0 %v2139_v5  ;;  %v1855_v28 = vld [vmem:[#allocation5 + $0x234] sm:$0xf0]  ;;  %v1790_v29 = vld [vmem:[#allocation5 + $0x34] sm:$0xf]  ;;  %v1290_v30 = vld [vmem:[#allocation5 + $0x38] sm:$0xf0]  ;;  %v1365_v34 = vor.u32 %v1808_v23, %v1362_v26 }
  0x3a   :  { %770 = vmatpush.bf16.msrb.mxu0 %v1577_v43  ;;  %752 = vmatmul.bf16.vlgmr.msra.gmra.mxu2 %v2135_v53  ;;  %v101_v31 = vld [vmem:[#allocation2 + $0x18] sm:$0xf]  ;;  %v1608_v35 = vld [vmem:[#allocation5 + $0x2b0] sm:$0xf]  ;;  %v1871_v36 = vld [vmem:[#allocation5 + $0x2b4] sm:$0xf0]  ;;  %v1545_v37 = vor.u32 %v1855_v28, %v1544_v27  ;;  %v1293_v38 = vor.u32 %v1790_v29, %v1290_v30 }
  0x3b   :  { %803 = vmatpush.bf16.msrb.mxu2 %v1649_v49  ;;  %765 = vmatmul.bf16.vlgmr.msra.gmra.mxu3 %v2137_v60  ;;  %v210_v33 = vunpack.c.l.b16 %v101_v31  ;;  %v1806_v39 = vld [vmem:[#allocation5 + $0xb4] sm:$0xf]  ;;  %v1354_v40 = vld [vmem:[#allocation5 + $0xb8] sm:$0xf0]  ;;  %v1536_v41 = vld [vmem:[#allocation5 + $0x220] sm:$0xf]  ;;  %v1609_v45 = vor.u32 %v1871_v36, %v1608_v35 }
  0x3c   :  { %809 = vmatpush.bf16.msrb.mxu3 %v1325_v44  ;;  %739 = vmatmul.bf16.vlgmr.msra.gmra.mxu1 %v2141_v6  ;;  %v1853_v42 = vld [vmem:[#allocation5 + $0x224] sm:$0xf0]  ;;  %v1788_v43 = vld [vmem:[#allocation5 + $0x24] sm:$0xf]  ;;  %v1282_v44 = vld [vmem:[#allocation5 + $0x28] sm:$0xf0]  ;;  %v1357_v47 = vor.u32 %v1806_v39, %v1354_v40 }
  0x3d   :  { %783 = vmatpush.bf16.msrb.mxu1 %v1641_v54  ;;  %v2147_v46 = vpack.c.b16 %v210_v33, %v210_v33  ;;  %v1600_v48 = vld [vmem:[#allocation5 + $0x2a0] sm:$0xf]  ;;  %v1869_v49 = vld [vmem:[#allocation5 + $0x2a4] sm:$0xf0]  ;;  %v1537_v50 = vor.u32 %v1853_v42, %v1536_v41  ;;  %v1285_v51 = vor.u32 %v1788_v43, %v1282_v44  ;;  %v1804_v52 = vld [vmem:[#allocation5 + $0xa4] sm:$0xf] }
  0x3e   :  { %771 = vmatpush.bf16.msrb.mxu0 %v1569_v61  ;;  %v1346_v54 = vld [vmem:[#allocation5 + $0xa8] sm:$0xf0]  ;;  %v1528_v55 = vld [vmem:[#allocation5 + $0x210] sm:$0xf]  ;;  %v1851_v56 = vld [vmem:[#allocation5 + $0x214] sm:$0xf0]  ;;  %v1601_v59 = vor.u32 %v1869_v49, %v1600_v48 }
  0x3f   :  { %822 = vmatpush.bf16.msra.mxu2 %v1389_v57  ;;  %v1786_v57 = vld [vmem:[#allocation5 + $0x14] sm:$0xf]  ;;  %v1274_v58 = vld [vmem:[#allocation5 + $0x18] sm:$0xf0]  ;;  %v1592_v61 = vld [vmem:[#allocation5 + $0x290] sm:$0xf]  ;;  %v1529_v2 = vor.u32 %v1851_v56, %v1528_v55 }
  0x40   :  { %810 = vmatpush.bf16.msrb.mxu3 %v1317_v62  ;;  %v1349_v62 = vor.u32 %v1804_v52, %v1346_v54  ;;  %v1867_v63 = vld [vmem:[#allocation5 + $0x294] sm:$0xf0]  ;;  %v1802_v0 = vld [vmem:[#allocation5 + $0x94] sm:$0xf]  ;;  %v1338_v1 = vld [vmem:[#allocation5 + $0x98] sm:$0xf0]  ;;  %v1277_v3 = vor.u32 %v1786_v57, %v1274_v58 }
  0x41   :  { %784 = vmatpush.bf16.msrb.mxu1 %v1633_v7  ;;  %v1520_v4 = vld [vmem:[#allocation5 + $0x200] sm:$0xf]  ;;  %v1849_v7 = vld [vmem:[#allocation5 + $0x204] sm:$0xf0]  ;;  %v1784_v9 = vld [vmem:[#allocation5 + $0x4] sm:$0xf]  ;;  %v1341_v16 = vor.u32 %v1802_v0, %v1338_v1 }
  0x42   :  { %772 = vmatpush.bf16.msrb.mxu0 %v1561_v11  ;;  %v1266_v10 = vld [vmem:[#allocation5 + $0x8] sm:$0xf0]  ;;  %v1830_v11 = vld [vmem:[#allocation5 + $0x174] sm:$0xf]  ;;  %v1450_v13 = vld [vmem:[#allocation5 + $0x178] sm:$0xf0] }
  0x43   :  { %823 = vmatpush.bf16.msra.mxu2 %v1381_v8  ;;  %v100_v8 = vld [vmem:[#allocation2 + $0x10] sm:$0xff]  ;;  %v1578_v15 = vld [vmem:[#allocation5 + $0x278] sm:$0xf0]  ;;  %v1584_v17 = vld [vmem:[#allocation5 + $0x280] sm:$0xf]  ;;  %v1269_v21 = vor.u32 %v1784_v9, %v1266_v10  ;;  %s1248_s4 = sshll.u32 %s2089_s2, 4  ;;  %s1249_s4 = int_to_ptr.vmem [resolvable:$true] %s1248_s4 }
  0x44   :  { %811 = vmatpush.bf16.msrb.mxu3 %v1309_v12  ;;  %v1593_v12 = vor.u32 %v1867_v63, %v1592_v61  ;;  %v1862_v14 = vld [vmem:[#allocation5 + $0x274] sm:$0xf]  ;;  %v1865_v18 = vld [vmem:[#allocation5 + $0x284] sm:$0xf0]  ;;  %v1800_v22 = vld [vmem:[#allocation5 + $0x84] sm:$0xf]  ;;  %v209_v30 = vunpack.c.h.b16 %v100_v8 }
  0x45   :  { %785 = vmatpush.bf16.msrb.mxu1 %v1625_v19  ;;  %v208_v19 = vunpack.c.l.b16 %v100_v8  ;;  %v1330_v23 = vld [vmem:[#allocation5 + $0x88] sm:$0xf0]  ;;  %v1581_v26 = vor.u32 %v1862_v14, %v1578_v15  ;;  %v1514_v27 = vld [vmem:[#allocation5 + $0x1f8] sm:$0xf0]  ;;  %v1878_v28 = vld [vmem:[#allocation5 + $0x2f4] sm:$0xf]  ;;  %v1585_v31 = vor.u32 %v1865_v18, %v1584_v17 }
  0x46   :  { %773 = vmatpush.bf16.msrb.mxu0 %v1553_v24  ;;  %v1846_v24 = vld [vmem:[#allocation5 + $0x1f4] sm:$0xf]  ;;  %v1642_v29 = vld [vmem:[#allocation5 + $0x2f8] sm:$0xf0]  ;;  %v1442_v33 = vld [vmem:[#allocation5 + $0x168] sm:$0xf0]  ;;  %v1333_v35 = vor.u32 %v1800_v22, %v1330_v23  ;;  %v2153_v41 = vpack.c.b16 %v209_v30, %v209_v30 }
  0x47   :  { %824 = vmatpush.bf16.msra.mxu2 %v1373_v20  ;;  %v1521_v20 = vor.u32 %v1849_v7, %v1520_v4  ;;  %v1860_v36 = vld [vmem:[#allocation5 + $0x264] sm:$0xf]  ;;  %v1645_v39 = vor.u32 %v1878_v28, %v1642_v29  ;;  %v1506_v43 = vld [vmem:[#allocation5 + $0x1e8] sm:$0xf0]  ;;  %v1826_v48 = vld [vmem:[#allocation5 + $0x154] sm:$0xf] }
  0x48   :  { %812 = vmatpush.bf16.msrb.mxu3 %v1301_v25  ;;  %v1453_v25 = vor.u32 %v1830_v11, %v1450_v13  ;;  %v1844_v40 = vld [vmem:[#allocation5 + $0x1e4] sm:$0xf]  ;;  %v1434_v49 = vld [vmem:[#allocation5 + $0x158] sm:$0xf0]  ;;  %v1842_v55 = vld [vmem:[#allocation5 + $0x1d4] sm:$0xf] }
  0x49   :  { %786 = vmatpush.bf16.msrb.mxu1 %v1617_v32  ;;  %v1828_v32 = vld [vmem:[#allocation5 + $0x164] sm:$0xf]  ;;  %v1509_v52 = vor.u32 %v1844_v40, %v1506_v43  ;;  %v1437_v56 = vor.u32 %v1826_v48, %v1434_v49  ;;  %v1498_v57 = vld [vmem:[#allocation5 + $0x1d8] sm:$0xf0]  ;;  %v1874_v58 = vld [vmem:[#allocation5 + $0x2d4] sm:$0xf] }
  0x4a   :  { %774 = vmatpush.bf16.msrb.mxu0 %v1545_v37  ;;  %1654 = vmatmul.msk.bf16.vlgmr.msrb.gmra.mxu2 %vm714_vm0, %v2147_v46  ;;  %v1570_v37 = vld [vmem:[#allocation5 + $0x268] sm:$0xf0]  ;;  %v1445_v42 = vor.u32 %v1828_v32, %v1442_v33  ;;  %v1876_v44 = vld [vmem:[#allocation5 + $0x2e4] sm:$0xf]  ;;  %v1418_v13 = vld [vmem:[#allocation5 + $0x138] sm:$0xf0] }
  0x4b   :  { %825 = vmatpush.bf16.msra.mxu2 %v1365_v34  ;;  %v2151_v34 = vpack.c.b16 %v208_v19, %v208_v19  ;;  %v1426_v63 = vld [vmem:[#allocation5 + $0x148] sm:$0xf0]  ;;  %v1856_v0 = vld [vmem:[#allocation5 + $0x244] sm:$0xf]  ;;  %v1854_v14 = vld [vmem:[#allocation5 + $0x234] sm:$0xf] }
  0x4c   :  { %813 = vmatpush.bf16.msrb.mxu3 %v1293_v38  ;;  %v1517_v38 = vor.u32 %v1846_v24, %v1514_v27  ;;  %v1554_v1 = vld [vmem:[#allocation5 + $0x248] sm:$0xf0]  ;;  %v1840_v4 = vld [vmem:[#allocation5 + $0x1c4] sm:$0xf]  ;;  %v1482_v18 = vld [vmem:[#allocation5 + $0x1b8] sm:$0xf0] }
  0x4d   :  { %787 = vmatpush.bf16.msrb.mxu1 %v1609_v45  ;;  %v1634_v45 = vld [vmem:[#allocation5 + $0x2e8] sm:$0xf0]  ;;  %v1872_v9 = vld [vmem:[#allocation5 + $0x2c4] sm:$0xf]  ;;  %v1557_v11 = vor.u32 %v1856_v0, %v1554_v1  ;;  %v1870_v19 = vld [vmem:[#allocation5 + $0x2b4] sm:$0xf] }
  0x4e   :  { %775 = vmatpush.bf16.msrb.mxu0 %v1537_v50  ;;  %v1858_v50 = vld [vmem:[#allocation5 + $0x254] sm:$0xf]  ;;  %v1637_v54 = vor.u32 %v1876_v44, %v1634_v45  ;;  %v1490_v8 = vld [vmem:[#allocation5 + $0x1c8] sm:$0xf0]  ;;  %v1820_v22 = vld [vmem:[#allocation5 + $0x124] sm:$0xf] }
  0x4f   :  { %826 = vmatpush.bf16.msra.mxu2 %v1357_v47  ;;  %v1573_v47 = vor.u32 %v1860_v36, %v1570_v37  ;;  %v1618_v10 = vld [vmem:[#allocation5 + $0x2c8] sm:$0xf0]  ;;  %v1493_v15 = vor.u32 %v1840_v4, %v1490_v8  ;;  %v1852_v24 = vld [vmem:[#allocation5 + $0x224] sm:$0xf]  ;;  %v1402_v36 = vld [vmem:[#allocation5 + $0x118] sm:$0xf0] }
  0x50   :  { %814 = vmatpush.bf16.msrb.mxu3 %v1285_v51  ;;  %v1562_v51 = vld [vmem:[#allocation5 + $0x258] sm:$0xf0]  ;;  %v1410_v23 = vld [vmem:[#allocation5 + $0x128] sm:$0xf0]  ;;  %v1836_v28 = vld [vmem:[#allocation5 + $0x1a4] sm:$0xf] }
  0x51   :  { %788 = vmatpush.bf16.msrb.mxu1 %v1601_v59  ;;  %v1626_v59 = vld [vmem:[#allocation5 + $0x2d8] sm:$0xf0]  ;;  %v1565_v61 = vor.u32 %v1858_v50, %v1562_v51  ;;  %v1413_v29 = vor.u32 %v1820_v22, %v1410_v23  ;;  %v1474_v30 = vld [vmem:[#allocation5 + $0x1a8] sm:$0xf0]  ;;  %v1850_v37 = vld [vmem:[#allocation5 + $0x214] sm:$0xf] }
  0x52   :  { %776 = vmatpush.bf16.msrb.mxu0 %v1529_v2  ;;  %v1501_v2 = vor.u32 %v1842_v55, %v1498_v57  ;;  %v1602_v32 = vld [vmem:[#allocation5 + $0x2a8] sm:$0xf0]  ;;  %v1466_v44 = vld [vmem:[#allocation5 + $0x198] sm:$0xf0]  ;;  %v1866_v45 = vld [vmem:[#allocation5 + $0x294] sm:$0xf] }
  0x53   :  { %827 = vmatpush.bf16.msra.mxu2 %v1349_v62  ;;  %v1824_v62 = vld [vmem:[#allocation5 + $0x144] sm:$0xf]  ;;  %v1394_v50 = vld [vmem:[#allocation5 + $0x108] sm:$0xf0]  ;;  %v1887_v8 = vld [vmem:[#allocation7 + $0x28] sm:$0xff]  ;;  %s1250_s21 = sshll.u32 %s2173_s5, 4  ;;  %s1251_s21 = int_to_ptr.hbm [resolvable:$true] %s1250_s21 }
  0x54   :  { %815 = vmatpush.bf16.msrb.mxu3 %v1277_v3  ;;  %v1629_v3 = vor.u32 %v1874_v58, %v1626_v59  ;;  %v1429_v7 = vor.u32 %v1824_v62, %v1426_v63  ;;  %v1816_v49 = vld [vmem:[#allocation5 + $0x104] sm:$0xf]  ;;  %v1650_v55 = vld [vmem:[#allocation5 + $0x308] sm:$0xf0]  ;;  %v1894_v23 = vld [vmem:[#allocation7 + $0x60] sm:$0xff] }
  0x55   :  { %789 = vmatpush.bf16.msrb.mxu1 %v1593_v12  ;;  %v1822_v12 = vld [vmem:[#allocation5 + $0x134] sm:$0xf]  ;;  %v1848_v51 = vld [vmem:[#allocation5 + $0x204] sm:$0xf]  ;;  %v1397_v58 = vor.u32 %v1816_v49, %v1394_v50  ;;  %v1586_v0 = vld [vmem:[#allocation5 + $0x288] sm:$0xf0] }
  0x56   :  { %777 = vmatpush.bf16.msrb.mxu0 %v1521_v20  ;;  %v1421_v17 = vor.u32 %v1822_v12, %v1418_v13  ;;  %v1610_v20 = vld [vmem:[#allocation5 + $0x2b8] sm:$0xf0]  ;;  %v1832_v59 = vld [vmem:[#allocation5 + $0x184] sm:$0xf]  ;;  %v1889_v4 = vld [vmem:[#allocation7 + $0x38] sm:$0xff] }
  0x57   :  { %828 = vmatpush.bf16.msra.mxu2 %v1341_v16  ;;  %v1838_v16 = vld [vmem:[#allocation5 + $0x1b4] sm:$0xf]  ;;  %v1613_v27 = vor.u32 %v1870_v19, %v1610_v20  ;;  %v1864_v63 = vld [vmem:[#allocation5 + $0x284] sm:$0xf]  ;;  %v1897_v13 = vld [vmem:[#allocation7 + $0x78] sm:$0xff] }
  0x58   :  { %816 = vmatpush.bf16.msrb.mxu3 %v1269_v21  ;;  %v1895_v20 = vld [vmem:[#allocation7 + $0x68] sm:$0xff] }
  0x59   :  { %790 = vmatpush.bf16.msrb.mxu1 %v1585_v31  ;;  %778 = vmatmul.bf16.vlgmr.msrb.gmra.mxu0 %v2151_v34  ;;  %v1868_v31 = vld [vmem:[#allocation5 + $0x2a4] sm:$0xf] }
  0x5a   :  { %835 = vmatpush.bf16.msra.mxu0 %v1453_v25  ;;  %v1538_v25 = vld [vmem:[#allocation5 + $0x228] sm:$0xf0]  ;;  %v1605_v40 = vor.u32 %v1868_v31, %v1602_v32  ;;  %v1892_v32 = vld [vmem:[#allocation7 + $0x50] sm:$0xff] }
  0x5b   :  { %829 = vmatpush.bf16.msra.mxu2 %v1333_v35  ;;  %817 = vmatmul.bf16.vlgmr.msrb.gmra.mxu3 %v2139_v5  ;;  %v1621_v5 = vor.u32 %v1872_v9, %v1618_v10  ;;  %v1541_v33 = vor.u32 %v1852_v24, %v1538_v25  ;;  %v1818_v35 = vld [vmem:[#allocation5 + $0x114] sm:$0xf]  ;;  %v1885_v10 = vld [vmem:[#allocation7 + $0x18] sm:$0xff] }
  0x5c   :  { %861 = vmatpush.bf16.msra.mxu3 %v1581_v26  ;;  %791 = vmatmul.bf16.vlgmr.msrb.gmra.mxu1 %v2153_v41  ;;  %v1485_v26 = vor.u32 %v1838_v16, %v1482_v18  ;;  %v1405_v43 = vor.u32 %v1818_v35, %v1402_v36  ;;  %v1886_v9 = vld [vmem:[#allocation7 + $0x20] sm:$0xff]  ;;  %v1896_v16 = vld [vmem:[#allocation7 + $0x70] sm:$0xff] }
  0x5d   :  { %848 = vmatpush.bf16.msra.mxu1 %v1517_v38  ;;  %v1530_v38 = vld [vmem:[#allocation5 + $0x218] sm:$0xf0] }
  0x5e   :  { %836 = vmatpush.bf16.msra.mxu0 %v1445_v42  ;;  %830 = vmatmul.bf16.vlgmr.msra.gmra.mxu2 %v2141_v6  ;;  %v1546_v6 = vld [vmem:[#allocation5 + $0x238] sm:$0xf0]  ;;  %v1834_v42 = vld [vmem:[#allocation5 + $0x194] sm:$0xf]  ;;  %v1533_v48 = vor.u32 %v1850_v37, %v1530_v38 }
  0x5f   :  { %874 = vmatpush.bf16.msrb.mxu2 %v1645_v39  ;;  %v1549_v21 = vor.u32 %v1854_v14, %v1546_v6  ;;  %v1477_v39 = vor.u32 %v1836_v28, %v1474_v30  ;;  %v1893_v28 = vld [vmem:[#allocation7 + $0x58] sm:$0xff]  ;;  %v1891_v38 = vld [vmem:[#allocation7 + $0x48] sm:$0xff] }
  0x60   :  { %862 = vmatpush.bf16.msra.mxu3 %v1573_v47  ;;  %v1594_v47 = vld [vmem:[#allocation5 + $0x298] sm:$0xf0] }
  0x61   :  { %849 = vmatpush.bf16.msra.mxu1 %v1509_v52  ;;  %v1522_v52 = vld [vmem:[#allocation5 + $0x208] sm:$0xf0]  ;;  %v1597_v57 = vor.u32 %v1866_v45, %v1594_v47 }
  0x62   :  { %837 = vmatpush.bf16.msra.mxu0 %v1437_v56  ;;  %v1469_v56 = vor.u32 %v1834_v42, %v1466_v44  ;;  %v1525_v62 = vor.u32 %v1848_v51, %v1522_v52 }
  0x63   :  { %875 = vmatpush.bf16.msrb.mxu2 %v1637_v54  ;;  %v1880_v54 = vld [vmem:[#allocation5 + $0x304] sm:$0xf] }
  0x64   :  { %863 = vmatpush.bf16.msra.mxu3 %v1565_v61  ;;  %v1458_v61 = vld [vmem:[#allocation5 + $0x188] sm:$0xf0]  ;;  %v1653_v1 = vor.u32 %v1880_v54, %v1650_v55 }
  0x65   :  { %850 = vmatpush.bf16.msra.mxu1 %v1501_v2  ;;  %v1461_v2 = vor.u32 %v1832_v59, %v1458_v61 }
  0x66   :  { %838 = vmatpush.bf16.msra.mxu0 %v1429_v7  ;;  %v1888_v7 = vld [vmem:[#allocation7 + $0x30] sm:$0xff] }
  0x67   :  { %876 = vmatpush.bf16.msrb.mxu2 %v1629_v3  ;;  %v1589_v3 = vor.u32 %v1864_v63, %v1586_v0  ;;  %v1905_v0 = vld [vmem:[#allocation8 + $0x38] sm:$0xff] }
  0x68   :  { %864 = vmatpush.bf16.msra.mxu3 %v1557_v11 }
  0x69   :  { %851 = vmatpush.bf16.msra.mxu1 %v1493_v15 }
  0x6a   :  { %839 = vmatpush.bf16.msra.mxu0 %v1421_v17 }
  0x6b   :  { %877 = vmatpush.bf16.msrb.mxu2 %v1621_v5 }
  0x6c   :  { %865 = vmatpush.bf16.msra.mxu3 %v1549_v21 }
  0x6d   :  { %852 = vmatpush.bf16.msra.mxu1 %v1485_v26 }
  0x6e   :  { %840 = vmatpush.bf16.msra.mxu0 %v1413_v29 }
  0x6f   :  { %878 = vmatpush.bf16.msrb.mxu2 %v1613_v27 }
  0x70   :  { %866 = vmatpush.bf16.msra.mxu3 %v1541_v33 }
  0x71   :  { %853 = vmatpush.bf16.msra.mxu1 %v1477_v39  ;;  %v1890_v39 = vld [vmem:[#allocation7 + $0x40] sm:$0xff] }
  0x72   :  { %841 = vmatpush.bf16.msra.mxu0 %v1405_v43 }
  0x73   :  { %879 = vmatpush.bf16.msrb.mxu2 %v1605_v40 }
  0x74   :  { %867 = vmatpush.bf16.msra.mxu3 %v1533_v48 }
  0x75   :  { %854 = vmatpush.bf16.msra.mxu1 %v1469_v56 }
  0x76   :  { %842 = vmatpush.bf16.msra.mxu0 %v1397_v58 }
  0x77   :  { %880 = vmatpush.bf16.msrb.mxu2 %v1597_v57 }
  0x78   :  { %868 = vmatpush.bf16.msra.mxu3 %v1525_v62 }
  0x79   :  { %855 = vmatpush.bf16.msra.mxu1 %v1461_v2  ;;  %843 = vmatmul.bf16.vlgmr.msra.gmra.mxu0 %v2135_v53  ;;  %v1884_v53 = vld [vmem:[#allocation7 + $0x10] sm:$0xff]  ;;  %v1903_v2 = vld [vmem:[#allocation8 + $0x28] sm:$0xff] }
  0x7a   :  { %894 = vmatpush.bf16.msrb.mxu0 %v1653_v1  ;;  %v1904_v1 = vld [vmem:[#allocation8 + $0x30] sm:$0xff] }
  0x7b   :  { %869 = vmatmul.bf16.vlgmr.msra.gmra.mxu3 %v2151_v34  ;;  %881 = vmatpush.bf16.msrb.mxu2 %v1589_v3  ;;  %v1883_v34 = vld [vmem:[#allocation7 + $0x8] sm:$0xff]  ;;  %v1902_v3 = vld [vmem:[#allocation8 + $0x20] sm:$0xff] }
  0x7c   :  { %856 = vmatmul.bf16.vlgmr.msra.gmra.mxu1 %v2137_v60  ;;  %1045 = vmatpush.bf16.msrb.mxu3 %v1897_v13  ;;  %v1907_v13 = vld [vmem:[#allocation10 + $0x8] sm:$0xff] }
  0x7d   :  { %1032 = vmatpush.bf16.msrb.mxu1 %v1889_v4  ;;  %v1901_v4 = vld [vmem:[#allocation8 + $0x18] sm:$0xff] }
  0x7e   :  { %882 = vmatmul.bf16.vlgmr.msrb.gmra.mxu2 %v2153_v41  ;;  %v1882_v41 = vld [vmem:[#allocation7] sm:$0xff]  ;;  %1124 = vmatpush.bf16.msra.mxu0 %v1905_v0 }
  0x80   :  { %1046 = vmatpush.bf16.msrb.mxu3 %v1896_v16 }
  0x81   :  { %1033 = vmatpush.bf16.msrb.mxu1 %v1888_v7  ;;  %v1900_v7 = vld [vmem:[#allocation8 + $0x10] sm:$0xff] }
  0x82   :  { %1125 = vmatpush.bf16.msra.mxu0 %v1904_v1 }
  0x84   :  { %1047 = vmatpush.bf16.msrb.mxu3 %v1895_v20 }
  0x85   :  { %1034 = vmatpush.bf16.msrb.mxu1 %v1887_v8 }
  0x86   :  { %1126 = vmatpush.bf16.msra.mxu0 %v1903_v2 }
  0x88   :  { %1048 = vmatpush.bf16.msrb.mxu3 %v1894_v23 }
  0x89   :  { %1655 = vmatmul.msk.bf16.vlgmr.msrb.gmra.mxu0 %vm714_vm0, %v2147_v46  ;;  %1035 = vmatpush.bf16.msrb.mxu1 %v1886_v9 }
  0x8a   :  { %1127 = vmatpush.bf16.msra.mxu0 %v1902_v3 }
  0x8c   :  { %1049 = vmatpush.bf16.msrb.mxu3 %v1893_v28 }
  0x8d   :  { %1036 = vmatpush.bf16.msrb.mxu1 %v1885_v10  ;;  %v1899_v10 = vld [vmem:[#allocation8 + $0x8] sm:$0xff] }
  0x8e   :  { %1128 = vmatpush.bf16.msra.mxu0 %v1901_v4 }
  0x90   :  { %1050 = vmatpush.bf16.msrb.mxu3 %v1892_v32 }
  0x91   :  { %1037 = vmatpush.bf16.msrb.mxu1 %v1884_v53  ;;  %v1898_v53 = vld [vmem:[#allocation8] sm:$0xff] }
  0x92   :  { %1129 = vmatpush.bf16.msra.mxu0 %v1900_v7 }
  0x94   :  { %1051 = vmatpush.bf16.msrb.mxu3 %v1891_v38 }
  0x95   :  { %1038 = vmatpush.bf16.msrb.mxu1 %v1883_v34  ;;  %v1913_v34 = vld [vmem:[#allocation10 + $0x38] sm:$0xff] }
  0x96   :  { %1130 = vmatpush.bf16.msra.mxu0 %v1899_v10  ;;  %1203 = vmatpush.bf16.msra.mxu2 %v1913_v34 }
  0x98   :  { %1052 = vmatpush.bf16.msrb.mxu3 %v1890_v39 }
  0x99   :  { %1039 = vmatpush.bf16.msrb.mxu1 %v1882_v41  ;;  %v1910_v41 = vld [vmem:[#allocation10 + $0x20] sm:$0xff] }
  0x9a   :  { %1131 = vmatpush.bf16.msra.mxu0 %v1898_v53 }
  0xb6   :  { %v727_v60 = vpop.f32.mrf.mxu0 }
  0xb9   :  { %v740_v11 = vpop.f32.mrf.mxu1 }
  0xba   :  { %v741_v17 = vadd.f32 %v740_v11, %v727_v60  ;;  %v1912_v60 = vld [vmem:[#allocation10 + $0x30] sm:$0xff]  ;;  %v1911_v11 = vld [vmem:[#allocation10 + $0x28] sm:$0xff] }
  0xbb   :  { %1204 = vmatpush.bf16.msra.mxu2 %v1912_v60 }
  0xbd   :  { %v753_v12 = vpop.f32.mrf.mxu2 }
  0xbe   :  { %v766_v46 = vpop.f32.mrf.mxu3  ;;  %v729_v14 = vpop.f32.mrf.mxu0  ;;  %v754_v19 = vadd.f32 %v753_v12, %v741_v17  ;;  %v1909_v12 = vld [vmem:[#allocation10 + $0x18] sm:$0xff]  ;;  %v1906_v17 = vld [vmem:[#allocation10] sm:$0xff] }
  0xbf   :  { %1205 = vmatpush.bf16.msra.mxu2 %v1911_v11 }
  0xc0   :  { %v767_v21 = vadd.f32 %v766_v46, %v754_v19  ;;  %v1908_v46 = vld [vmem:[#allocation10 + $0x10] sm:$0xff] }
  0xc1   :  { %v742_v6 = vpop.f32.mrf.mxu1 }
  0xc3   :  { %1206 = vmatpush.bf16.msra.mxu2 %v1910_v41 }
  0xc5   :  { %v755_v15 = vpop.f32.mrf.mxu2 }
  0xc6   :  { %v768_v5 = vpop.f32.mrf.mxu3 }
  0xc7   :  { %1207 = vmatpush.bf16.msra.mxu2 %v1909_v12 }
  0xcb   :  { %1208 = vmatpush.bf16.msra.mxu2 %v1908_v46 }
  0xcd   :  { %v805_v18 = vpop.f32.mrf.mxu2 }
  0xcf   :  { %1209 = vmatpush.bf16.msra.mxu2 %v1907_v13 }
  0xd3   :  { %1210 = vmatpush.bf16.msra.mxu2 %v1906_v17 }
  0xd5   :  { %v807_v25 = vpop.f32.mrf.mxu2 }
  0xd6   :  { %v779_v22 = vpop.f32.mrf.mxu0 }
  0xd7   :  { %v780_v24 = vadd.f32 %v779_v22, %v767_v21  ;;  %v1216_v22 = vlaneseq }
  0xd9   :  { %v792_v26 = vpop.f32.mrf.mxu1  ;;  %v1217_v23 = vand.u32 127, %v1216_v22 }
  0xda   :  { %v793_v27 = vadd.f32 %v792_v26, %v780_v24 }
  0xdb   :  { %vm1218_vm1 = vcmp.lt.s32.totalorder %v1217_v23, 10 }
  0xdc   :  { %v806_v29 = vadd.f32 %v805_v18, %v793_v27 }
  0xde   :  { %v900_v30 = vmax.f32 %v806_v29, 0.0  ;;  %v781_v31 = vpop.f32.mrf.mxu0  ;;  %v818_v36 = vpop.f32.mrf.mxu3 }
  0xe0   :  { %v902_v33 = vpack.c.bf16 %v900_v30, %v900_v30 }
  0xe1   :  { %v831_v35 = vpop.f32.mrf.mxu2  ;;  %v794_v37 = vpop.f32.mrf.mxu1 }
  0xe2   :  { %1040 = vmatmul.bf16.vlgmr.msrb.gmra.mxu1 %v902_v33  ;;  %v832_v44 = vadd.f32 %v831_v35, %v818_v36 }
  0xe6   :  { %v820_v42 = vpop.f32.mrf.mxu3 }
  0xe9   :  { %v833_v40 = vpop.f32.mrf.mxu2 }
  0xf6   :  { %v844_v43 = vpop.f32.mrf.mxu0 }
  0xf7   :  { %v845_v47 = vadd.f32 %v844_v43, %v832_v44 }
  0xf9   :  { %v857_v45 = vpop.f32.mrf.mxu1 }
  0xfa   :  { %v858_v50 = vadd.f32 %v857_v45, %v845_v47 }
  0xfe   :  { %v870_v48 = vpop.f32.mrf.mxu3  ;;  %v846_v49 = vpop.f32.mrf.mxu0 }
  0xff   :  { %v871_v52 = vadd.f32 %v870_v48, %v858_v50 }
 0x101   :  { %v883_v51 = vpop.f32.mrf.mxu2  ;;  %v859_v54 = vpop.f32.mrf.mxu1 }
 0x102   :  { %v884_v55 = vadd.f32 %v883_v51, %v871_v52 }
 0x106   :  { %v872_v56 = vpop.f32.mrf.mxu3  ;;  %v896_v57 = vpop.f32.mrf.mxu0 }
 0x107   :  { %v897_v58 = vadd.f32 %v896_v57, %v884_v55 }
 0x109   :  { %v885_v59 = vpop.f32.mrf.mxu2  ;;  %v901_v61 = vmax.f32 %v897_v58, 0.0 }
 0x10b   :  { %v903_v62 = vpack.c.bf16 %v901_v61, %v901_v61 }
 0x10d   :  { %1053 = vmatmul.bf16.vlgmr.msrb.gmra.mxu3 %v903_v62 }
 0x10e   :  { %v898_v63 = vpop.f32.mrf.mxu0 }
 0x15f   :  { %v1041_v8 = vpop.f32.mrf.mxu1 }
 0x167   :  { %v1043_v9 = vpop.f32.mrf.mxu1 }
 0x190   :  { %v1054_v14 = vpop.f32.mrf.mxu3 }
 0x191   :  { %v1055_v6 = vadd.f32 %v1054_v14, %v1041_v8 }
 0x193   :  { %v1058_v15 = vmax.f32 %v1055_v6, 0.0 }
 0x195   :  { %v1059_v5 = vpack.c.bf16 %v1058_v15, %v1058_v15 }
 0x197   :  { %1132 = vmatmul.bf16.vlgmr.msra.gmra.mxu0 %v1059_v5 }
 0x198   :  { %v1056_v16 = vpop.f32.mrf.mxu3 }
 0x214   :  { %v1133_v18 = vpop.f32.mrf.mxu0 }
 0x215   :  { %v1137_v19 = vmax.f32 %v1133_v18, 0.0 }
 0x217   :  { %v1138_v20 = vpack.c.bf16 %v1137_v19, %v1137_v19 }
 0x219   :  { %1211 = vmatmul.bf16.vlgmr.msra.gmra.mxu2 %v1138_v20 }
 0x21c   :  { %v1135_v21 = vpop.f32.mrf.mxu0 }
 0x29c   :  { %v1212_v24 = vpop.f32.mrf.mxu2 }
 0x29d   :  { %v1219_v25 = vsel %vm1218_vm1, %v1212_v24, -inf }
 0x29e   :  { %1220 = vmax.xlane.f32.xlu0 %v1219_v25 }
 0x2a4   :  { %v1214_v26 = vpop.f32.mrf.mxu2 }
 0x311   :  { %v1221_v27 = vpop.xlane.xlu0 %1220 }
 0x312   :  { %v1222_v28 = vsub.f32 %v1219_v25, %v1221_v27 }
 0x314   :  { %v1223_v29 = vmul.f32 1.442695, %v1222_v28 }
 0x316   :  { %1924 = vpow2.f32 %v1223_v29 }
 0x31c   :  { %v1925_v30 = vpop.eup %1924 }
 0x31d   :  { %1225 = vadd.xlane.f32.xlu0 %v1925_v30 }
 0x390   :  { %v1226_v31 = vpop.xlane.xlu0 %1225 }
 0x391   :  { %1926 = vrcp.f32 %v1226_v31  ;;  %v1238_v36 = vand.u32 2147483648, %v1226_v31  ;;  %v1236_v38 = vand.u32 2147483647, %v1226_v31  ;;  %vm1232_vm3 = vweird.f32 %v1226_v31 }
 0x393   :  { %v1239_v40 = vor.u32 1.1754944e-38, %v1238_v36  ;;  %vm1237_vm5 = vcmp.eq.f32.partialorder %v1236_v38, 8.507059e+37 }
 0x397   :  { %v1927_v32 = vpop.eup %1926 }
 0x398   :  { %v1228_v33 = vmul.f32 %v1927_v32, %v1226_v31  ;;  %vm1233_vm2 = vweird.f32 %v1927_v32 }
 0x399   :  { %vm1234_vm4 = vmor %vm1232_vm3, %vm1233_vm2 }
 0x39a   :  { %v1229_v35 = vsub.f32 1.0, %v1228_v33 }
 0x39c   :  { %v1230_v37 = vmul.f32 %v1927_v32, %v1229_v35 }
 0x39e   :  { %v1231_v39 = vadd.f32 %v1927_v32, %v1230_v37 }
 0x3a0   :  { %v1235_v42 = vsel %vm1234_vm4, %v1927_v32, %v1231_v39 }
 0x3a1   :  { %v1240_v43 = vsel %vm1237_vm5, %v1239_v40, %v1235_v42 }
 0x3a2   :  { %v1241_v44 = vmul.f32 %v1925_v30, %v1240_v43 }
 0x3a4   :  { %1242 = vst [vmem:[#allocation11] sm:$0xff] %v1241_v44 }
 0x3a5   :  { %1253 = dma.vmem_to_hbm [thread:$0]  %s1249_s4, 128, %s1251_s21, [#allocation4]  }
 0x3a6   :  { %2078 = dma.done.wait [#allocation4], 128  }
 0x3a7   :  { %2079 = vsyncadd [#allocation4], 4294967168 }
 0x3a8   :  { %1258 = vsyncpa [#allocation3], 1 }
 0x3a9   :  { %1259 = vsyncpa [#allocation6], 1 }
 0x3aa   :  { %1260 = vsyncpa [#allocation9], 1 }
 0x3ab   :  { %1261 = vsyncpa [#allocation4], 1 }

</bundles_post_ra>
